<compile_context>
chip_gen: v7x
topology: tpu7x:2x2x1
jax: 0.10.0
libtpu: 0.0.40
codegen_flags: <defaults>
</compile_context>

<pallas_src>
import jax
import jax.numpy as jnp
import numpy as np
from jax.experimental import pallas as pl
from jax.experimental.pallas import tpu as pltpu


def _cdiv(a, b):
    return -(-a // b)


def _round_up(x, m):
    return ((x + m - 1) // m) * m


def _proj_bias_kernel(a_ref, w_ref, bias_ref, o_ref):
    # (tm, Kp) bf16 @ (Kp, C_out) bf16 -> f32 on the MXU, add per-channel f32 bias,
    # cast to the output dtype (bf16 by default) for lane stores / HBM writeback.
    acc = jnp.dot(a_ref[...], w_ref[...], preferred_element_type=jnp.float32)
    o_ref[...] = (acc + bias_ref[...]).astype(o_ref.dtype)


def _choose_m_tiling(M, *, row_align=16, tm_max=2048):
    """Pick (tm, steps, Mp): tm <= tm_max, multiple of 16, even #steps >= 2."""
    steps = max(2, _round_up(_cdiv(M, tm_max), 2))   # even, >=2 -> both v7x TCs busy
    tm = _round_up(_cdiv(M, steps), row_align)       # 16-row align (bf16 sublane pack)
    return tm, steps, tm * steps


def patch_embedding_forward(x, w, b, gamma, beta, running_mean, running_var,
                            *, stride=2, eps=1e-5, out_dtype=jnp.bfloat16,
                            tm_max=2048):
    """x: (B, C_in, H, W) f32 -> (B, H_out, W_out, C_out) in `out_dtype` (eval-mode BN)."""
    B, C_in, H, W = x.shape
    C_out, _, KH, KW = w.shape
    H_out = (H - KH) // stride + 1
    W_out = (W - KW) // stride + 1
    M = B * H_out * W_out
    K = KH * KW * C_in
    N = C_out

    Kp = _round_up(K, 16)                 # bf16 sublane multiple only; never pad K to 128
    tm, steps, Mp = _choose_m_tiling(M, tm_max=tm_max)

    # ---- im2col glue (plain JAX): bf16 immediately, K pad fused into the concat ----
    x_nhwc = jnp.transpose(x, (0, 2, 3, 1)).astype(jnp.bfloat16)   # (B, H, W, C_in)
    cols = []
    for kh in range(KH):
        for kw in range(KW):
            cols.append(
                x_nhwc[:,
                       kh: kh + stride * (H_out - 1) + 1: stride,
                       kw: kw + stride * (W_out - 1) + 1: stride,
                       :])
    if Kp > K:
        cols.append(jnp.zeros((B, H_out, W_out, Kp - K), jnp.bfloat16))
    # Feature order: kh-major, kw, c_in-minor (+ zero K-pad) -> (M, Kp) bf16.
    a_p = jnp.concatenate(cols, axis=-1).reshape(M, Kp)
    if Mp > M:
        a_p = jnp.pad(a_p, ((0, Mp - M), (0, 0)))    # single row-pad pass (zeros)

    # ---- fold conv bias + eval-mode BN into the weights + a per-channel f32 bias ---
    # Weight to the same K ordering: (C_out, C_in, KH, KW) -> (KH, KW, C_in, C_out).
    w_mat = jnp.transpose(w, (2, 3, 1, 0)).reshape(K, N).astype(jnp.float32)
    bn_scale = gamma / jnp.sqrt(running_var + eps)                 # per output channel
    w_fused = (w_mat * bn_scale[None, :]).astype(jnp.bfloat16)     # fold scale into W
    w_p = jnp.pad(w_fused, ((0, Kp - K), (0, 0)))                  # (Kp, N), K pad only
    bias = ((b - running_mean) * bn_scale + beta).astype(jnp.float32)[None, :]  # (1, N)

    out_p = pl.pallas_call(
        _proj_bias_kernel,
        out_shape=jax.ShapeDtypeStruct((Mp, N), out_dtype),        # no N padding
        grid=(steps,),
        in_specs=[
            pl.BlockSpec((tm, Kp), lambda i: (i, 0)),   # streamed A tiles
            pl.BlockSpec((Kp, N), lambda i: (0, 0)),    # resident fused weights
            pl.BlockSpec((1, N), lambda i: (0, 0)),     # resident fused bias
        ],
        out_specs=pl.BlockSpec((tm, N), lambda i: (i, 0)),  # full-C_out block per M tile
        compiler_params=pltpu.CompilerParams(
            dimension_semantics=("parallel",)),          # even #steps -> v7x dual-TC
    )(a_p, w_p, bias)

    # Only padded rows to drop; no column slice anymore.
    return out_p[:M].reshape(B, H_out, W_out, C_out)


def _reference(x, w, b, gamma, beta, running_mean, running_var, *, stride=2, eps=1e-5):
    """Pure-JAX f32 reference mirroring the PyTorch module (eval-mode BN)."""
    y = jax.lax.conv_general_dilated(
        x, w, window_strides=(stride, stride), padding="VALID",
        dimension_numbers=("NCHW", "OIHW", "NCHW"))
    y = y + b[None, :, None, None]
    y = (y - running_mean[None, :, None, None]) / jnp.sqrt(
        running_var[None, :, None, None] + eps)
    y = y * gamma[None, :, None, None] + beta[None, :, None, None]
    return jnp.transpose(y, (0, 2, 3, 1))  # (B, H, W, C)


if __name__ == "__main__":
    # Small shapes consistent with the module defaults: B=2, C_in=3, H=W=16, C_out=96.
    B, C_in, H, W = 2, 3, 16, 16
    C_out, KH, KW, stride = 96, 3, 3, 2

    key = jax.random.PRNGKey(0)
    kx, kw_, kb, kg, kbt, krm, krv = jax.random.split(key, 7)

    x = jax.random.normal(kx, (B, C_in, H, W), jnp.float32)
    w = jax.random.normal(kw_, (C_out, C_in, KH, KW), jnp.float32) * 0.1
    b = jax.random.normal(kb, (C_out,), jnp.float32) * 0.1
    gamma = 1.0 + 0.1 * jax.random.normal(kg, (C_out,), jnp.float32)
    beta = 0.1 * jax.random.normal(kbt, (C_out,), jnp.float32)
    running_mean = 0.1 * jax.random.normal(krm, (C_out,), jnp.float32)
    running_var = jnp.abs(jax.random.normal(krv, (C_out,), jnp.float32)) + 0.5

    out = patch_embedding_forward(x, w, b, gamma, beta, running_mean, running_var,
                                  stride=stride)
    out = jax.block_until_ready(out)

    ref = _reference(x, w, b, gamma, beta, running_mean, running_var, stride=stride)
    # bf16 operands + bf16 output vs f32 reference: loosened tolerance.
    np.testing.assert_allclose(np.asarray(out, dtype=np.float32), np.asarray(ref),
                               rtol=2e-2, atol=2e-2)

    assert out.shape == (B, (H - KH) // stride + 1, (W - KW) // stride + 1, C_out)
    print("KERNEL_OK")
</pallas_src>

<mosaic_0001>
module attributes {stable_mosaic.version = 11 : i64} {
  func.func @_proj_bias_kernel(%arg0: i32, %arg1: memref<64x32xbf16, #tpu.memory_space<vmem>>, %arg2: memref<32x96xbf16, #tpu.memory_space<vmem>>, %arg3: memref<1x96xf32, #tpu.memory_space<vmem>>, %arg4: memref<64x96xbf16, #tpu.memory_space<vmem>>) attributes {dimension_semantics = [#tpu.dimension_semantics<parallel>], iteration_bounds = array<i64: 2>, scalar_prefetch = 0 : i64, scratch_operands = 0 : i64, tpu.core_type = #tpu.core_type<tc>, window_params = [{transform_indices = @transform_0, window_bounds = array<i64: 64, 32>}, {pipeline_mode = #tpu.pipeline_mode<synchronous>, transform_indices = @transform_1, window_bounds = array<i64: 32, 96>}, {pipeline_mode = #tpu.pipeline_mode<synchronous>, transform_indices = @transform_2, window_bounds = array<i64: 1, 96>}, {transform_indices = @transform_3, window_bounds = array<i64: 64, 96>}]} {
    %c0 = arith.constant 0 : index
    %c0_0 = arith.constant 0 : index
    %0 = vector.load %arg1[%c0, %c0_0] : memref<64x32xbf16, #tpu.memory_space<vmem>>, vector<64x32xbf16>
    %c0_1 = arith.constant 0 : index
    %c0_2 = arith.constant 0 : index
    %1 = vector.load %arg2[%c0_1, %c0_2] : memref<32x96xbf16, #tpu.memory_space<vmem>>, vector<32x96xbf16>
    %cst = arith.constant dense<0.000000e+00> : vector<64x96xf32>
    %2 = tpu.matmul %0, %1, %cst {dimension_numbers = #tpu.dot_dimension_numbers<[1], [0], [0], [1], [0, 0, 1, 1], [], []>} : vector<64x32xbf16>, vector<32x96xbf16>, vector<64x96xf32> -> vector<64x96xf32>
    %c0_3 = arith.constant 0 : index
    %c0_4 = arith.constant 0 : index
    %3 = vector.load %arg3[%c0_3, %c0_4] : memref<1x96xf32, #tpu.memory_space<vmem>>, vector<1x96xf32>
    %4 = vector.broadcast %3 : vector<1x96xf32> to vector<64x96xf32>
    %5 = arith.addf %2, %4 : vector<64x96xf32>
    %6 = arith.truncf %5 : vector<64x96xf32> to vector<64x96xbf16>
    %c0_5 = arith.constant 0 : index
    %c0_6 = arith.constant 0 : index
    %7 = vector.load %arg4[%c0_5, %c0_6] : memref<64x96xbf16, #tpu.memory_space<vmem>>, vector<64x96xbf16>
    tpu.vector_store %arg4[%c0_5, %c0_6], %6 {strides = array<i32>} : memref<64x96xbf16, #tpu.memory_space<vmem>>, vector<64x96xbf16>,
    return
  }
  func.func @transform_0(%arg0: i32) -> (i32, i32) {
    %c0_i32 = arith.constant 0 : i32
    %c0_i32_0 = arith.constant 0 : i32
    return %arg0, %c0_i32 : i32, i32
  }
  func.func @transform_1(%arg0: i32) -> (i32, i32) {
    %c0_i32 = arith.constant 0 : i32
    %c0_i32_0 = arith.constant 0 : i32
    %c0_i32_1 = arith.constant 0 : i32
    return %c0_i32, %c0_i32_0 : i32, i32
  }
  func.func @transform_2(%arg0: i32) -> (i32, i32) {
    %c0_i32 = arith.constant 0 : i32
    %c0_i32_0 = arith.constant 0 : i32
    %c0_i32_1 = arith.constant 0 : i32
    return %c0_i32, %c0_i32_0 : i32, i32
  }
  func.func @transform_3(%arg0: i32) -> (i32, i32) {
    %c0_i32 = arith.constant 0 : i32
    %c0_i32_0 = arith.constant 0 : i32
    return %arg0, %c0_i32 : i32, i32
  }
}

</mosaic_0001>

<bundles_post_ra>
// kernel: tpu_custom_call.1
= control target key start
LH: loop header
LB: loop body
LE: loop exit
PB: predicated region body
PF: predicated region fallthrough
CT: control target
= control target key end

     0   :  { %s503_s12 = smov 0   ;;  %s537_s0 = inlined_call_operand.vmem [shape: bf16[128,32], index: 0, kind: input, shape index: {}]   ;;  %s538_s1 = inlined_call_operand.vmem [shape: bf16[32,96], index: 1, kind: input, shape index: {}]   ;;  %s539_s2 = inlined_call_operand.vmem [shape: f32[1,96], index: 2, kind: input, shape index: {}]   ;;  %s540_s3 = inlined_call_operand.vmem [shape: bf16[128,96], index: 3, kind: output, shape index: {}]  }
   0x1 LB: > { %s401_s13 = sadd.s32 4294967295, %s481_s12   ;;  %p405_p0 = scmp.ge.s32.totalorder %s481_s12, 1  ;;  %s481_s12 = sphi %s503_s12, %s13_s12  }
   0x2   : > { %p138_p1 = scmp.lt.s32.totalorder %s481_s12, 3 }
   0x4   : > { %p139_p2 = pnand %p405_p0, %p138_p1 }
   0x5   : > { %v469_v0 = vld [vmem:[%s538_s1] sm:$0xff] (!%p139_p2)   ;;  %s406_s16 = sshll.u32 (!%p139_p2), %s401_s13, 3  ;;  %v470_v1 = vld [vmem:[%s538_s1 + $0x8] sm:$0xff] (!%p139_p2)   ;;  %vm226_vm0 = vcmask (!%p139_p2), 261120   ;;  %vm336_vm1 = vcmask (!%p139_p2), 781312  }
   0x6   : > { %142 = sbr.rel (%p139_p2) target bundleno = 238 (0xee), region = 32  ;;  %p163_p3 = scmp.lt.s32.totalorder (!%p139_p2), %s406_s16, 15  ;;  %445 = vmatprep.subr.bf16.mxu0 (!%p139_p2), %v469_v0  ;;  %457 = vmatprep.subr.bf16.mxu1 (!%p139_p2), %v469_v0  ;;  %v410_v6 = vld [vmem:[%s539_s2] ss:$0 sm:$0xff] (!%p139_p2) }
   0x7   : > { %446 = vmatpush3.bf16.msra.mxu0 (!%p139_p2), %v469_v0  ;;  %459 = vmatpush3.bf16.msra.mxu1 (!%p139_p2), %v469_v0 }
   0x8   : > { %447 = vmatprep.subr.bf16.mxu0 (!%p139_p2), %v470_v1  ;;  %458 = vmatprep.subr.bf16.mxu1 (!%p139_p2), %v470_v1 }
   0xb   : > { %448 = vmatpush3.bf16.msra.mxu0 (!%p139_p2), %v470_v1  ;;  %460 = vmatpush3.bf16.msra.mxu1 (!%p139_p2), %v470_v1 }
   0xd   : > { %s542_s16 = smov (!%p163_p3, %s406_s16), 15 }
   0xe   : > { %s407_s19 = sshll.u32 %s542_s16, 2 }
   0xf   : > { %s166_s22 = scalar_lea.vmem %s537_s0, %s407_s19  ;;  %s172_s27 = scalar_lea.vmem %s540_s3, %s407_s19 }
  0x10   : > { %v471_v2 = vld [vmem:[%s166_s22] sm:$0xff]   ;;  %v472_v3 = vld [vmem:[%s166_s22 + $0x10] sm:$0xff]   ;;  %v473_v4 = vld [vmem:[%s166_s22 + $0x8] sm:$0xff]  }
  0x11   : > { %449 = vmatprep.mubr.msk.bf16.mxu0 %vm226_vm0, %v471_v2  ;;  %453 = vmatprep.mubr.msk.bf16.mxu1 %vm226_vm0, %v472_v3  ;;  %v474_v5 = vld [vmem:[%s166_s22 + $0x18] sm:$0xff]  }
  0x12   : > { %450 = vmatmul.mubr.msk.bf16.vlgmr.msra.gmra.mrb[0].mxu0 %vm226_vm0, %v473_v4  ;;  %454 = vmatmul.mubr.msk.bf16.vlgmr.msra.gmra.mrb[0].mxu1 %vm226_vm0, %v474_v5 }
  0xe5   : > { %v451_v7 = vpop.f32.mrb[0].mxu0  ;;  %v455_v9 = vpop.f32.mrb[0].mxu1 }
  0xe6   : > { %v282_v8 = vadd.f32 %v451_v7, %v410_v6  ;;  %v273_v10 = vpop.f32.mrb[1].mxu0  ;;  %v298_v11 = vadd.f32 %v455_v9, %v410_v6  ;;  %v289_v13 = vpop.f32.mrb[1].mxu1 }
  0xe7   : > { %v274_v12 = vadd.f32 %v410_v6, %v273_v10  ;;  %v452_v14 = vpop.f32.mrb[2].mxu0  ;;  %v290_v16 = vadd.f32 %v410_v6, %v289_v13  ;;  %v456_v18 = vpop.f32.mrb[2].mxu1 }
  0xe8   : > { %v433_v15 = vpack.c.bf16 %v282_v8, %v282_v8  ;;  %v285_v17 = vadd.f32 %v452_v14, %v410_v6  ;;  %v276_v19 = vpop.f32.mrb[3].mxu0  ;;  %v437_v20 = vpack.c.bf16 %v298_v11, %v298_v11  ;;  %v301_v22 = vadd.f32 %v456_v18, %v410_v6  ;;  %v292_v24 = vpop.f32.mrb[3].mxu1 }
  0xe9   : > { %v431_v21 = vpack.c.bf16 %v274_v12, %v274_v12  ;;  %v277_v23 = vadd.f32 %v410_v6, %v276_v19  ;;  %v435_v25 = vpack.c.bf16 %v290_v16, %v290_v16  ;;  %v293_v27 = vadd.f32 %v410_v6, %v292_v24 }
  0xea   : > { %339 = vst.msk [vmem:[%s172_s27 + $0x8] sm:$0xf] %vm336_vm1, %v433_v15  ;;  %v434_v26 = vpack.c.bf16 %v285_v17, %v285_v17  ;;  %343 = vst.msk [vmem:[%s172_s27 + $0x18] sm:$0xf] %vm336_vm1, %v437_v20  ;;  %v438_v28 = vpack.c.bf16 %v301_v22, %v301_v22 }
  0xeb   : > { %337 = vst.msk [vmem:[%s172_s27] sm:$0xf] %vm336_vm1, %v431_v21  ;;  %v432_v29 = vpack.c.bf16 %v277_v23, %v277_v23  ;;  %341 = vst.msk [vmem:[%s172_s27 + $0x10] sm:$0xf] %vm336_vm1, %v435_v25  ;;  %v436_v30 = vpack.c.bf16 %v293_v27, %v293_v27 }
  0xec   : > { %340 = vst.msk [vmem:[%s172_s27 + $0xc] sm:$0xf] %vm336_vm1, %v434_v26  ;;  %344 = vst.msk [vmem:[%s172_s27 + $0x1c] sm:$0xf] %vm336_vm1, %v438_v28 }
  0xed   : > { %338 = vst.msk [vmem:[%s172_s27 + $0x4] sm:$0xf] %vm336_vm1, %v432_v29  ;;  %342 = vst.msk [vmem:[%s172_s27 + $0x14] sm:$0xf] %vm336_vm1, %v436_v30 }
  0xee PF: > { %s13_s12 = sadd.s32 1, %s481_s12  }
  0xef   : > { %p10_p4 = scmp.ge.s32.totalorder %s13_s12, 4  }
  0xf1   :  { %12 = sbr.rel (!%p10_p4) target bundleno = 1 (0x1), region = 62 }

</bundles_post_ra>
